<compile_context>
chip_gen: v5e
topology: v5e:2x2
jax: 0.10.0
libtpu: 0.0.40
codegen_flags: <defaults>
</compile_context>

<pallas_src>
import math

import jax
import jax.numpy as jnp
from jax.experimental import pallas as pl
from jax.experimental.pallas import tpu as pltpu

LANE = 128


def _round_up(x, m):
    return ((x + m - 1) // m) * m


# ---------------------------------------------------------------------------
# Pass 1: degrees + (tiny) X @ W
# ---------------------------------------------------------------------------

def _prep_norm_kernel(a_ref, x_ref, w_ref, d_ref, xdt_ref, rowsum_ref):
    """Accumulate row-degrees of A over k-tiles; at the last k-tile emit
    D = rsqrt(rowsum + 1) and XDTheta = D * (X @ W) for this row tile."""
    k = pl.program_id(1)

    @pl.when(k == 0)
    def _():
        rowsum_ref[...] = jnp.zeros_like(rowsum_ref)

    rowsum_ref[...] += jnp.sum(a_ref[...], axis=1, keepdims=True)

    @pl.when(k == pl.num_programs(1) - 1)
    def _():
        d = jax.lax.rsqrt(rowsum_ref[...] + 1.0)                   # [tm, 1]
        d_ref[...] = d
        xtheta = jnp.dot(x_ref[...], w_ref[...],
                         preferred_element_type=jnp.float32)        # [tm, f_pad]
        xdt_ref[...] = d * xtheta


def _prep_nonorm_kernel(x_ref, w_ref, xt_ref):
    xt_ref[...] = jnp.dot(x_ref[...], w_ref[...],
                          preferred_element_type=jnp.float32)


# ---------------------------------------------------------------------------
# Pass 2: streamed A @ XDTheta with accumulator, D / self-loop / bias epilogue
# ---------------------------------------------------------------------------

def _stream_norm_kernel(a_ref, xdt_col_ref, xdt_row_ref, d_ref, b_ref,
                        o_ref, acc_ref):
    k = pl.program_id(1)

    @pl.when(k == 0)
    def _():
        acc_ref[...] = jnp.zeros_like(acc_ref)

    acc_ref[...] += jnp.dot(a_ref[...], xdt_col_ref[...],
                            preferred_element_type=jnp.float32)

    @pl.when(k == pl.num_programs(1) - 1)
    def _():
        o_ref[...] = d_ref[...] * (acc_ref[...] + xdt_row_ref[...]) + b_ref[...]


def _stream_nonorm_kernel(a_ref, xt_col_ref, b_ref, o_ref, acc_ref):
    k = pl.program_id(1)

    @pl.when(k == 0)
    def _():
        acc_ref[...] = jnp.zeros_like(acc_ref)

    acc_ref[...] += jnp.dot(a_ref[...], xt_col_ref[...],
                            preferred_element_type=jnp.float32)

    @pl.when(k == pl.num_programs(1) - 1)
    def _():
        o_ref[...] = acc_ref[...] + b_ref[...]


# ---------------------------------------------------------------------------
# Wrapper
# ---------------------------------------------------------------------------

def gcn_conv(A, X, weights, bias, normalize=True, tm=256, tk=512):
    """Pallas GCNConv forward.

    A: [N, N] dense adjacency, X: [N, F_in] (or [N]), weights: [F_in, F_out],
    bias: [F_out].  Returns [N, F_out].
    """
    if X.ndim == 1:
        X = X[:, None]
    A = jnp.asarray(A, jnp.float32)
    X = jnp.asarray(X, jnp.float32)
    weights = jnp.asarray(weights, jnp.float32)
    bias = jnp.asarray(bias, jnp.float32)

    N = A.shape[0]
    f_in = X.shape[1]
    f_out = weights.shape[1]

    # --- padding: lane-dense F_out, tile-aligned N ---------------------------
    assert tm % LANE == 0 and tk % LANE == 0
    f_pad = _round_up(f_out, LANE)
    tm_ = min(tm, _round_up(N, LANE))
    tk_ = min(tk, _round_up(N, LANE))
    n_pad = _round_up(N, math.lcm(tm_, tk_))

    A_p = jnp.pad(A, ((0, n_pad - N), (0, n_pad - N)))
    X_p = jnp.pad(X, ((0, n_pad - N), (0, 0)))
    W_p = jnp.pad(weights, ((0, 0), (0, f_pad - f_out)))
    b_p = jnp.pad(bias.reshape(1, f_out), ((0, 0), (0, f_pad - f_out)))

    n_rows = n_pad // tm_
    n_k = n_pad // tk_
    vmem_limit = 32 * 1024 * 1024
    cost = pl.CostEstimate(
        flops=2 * n_pad * n_pad * f_pad,
        transcendentals=0,
        bytes_accessed=n_pad * n_pad * 4 + 3 * n_pad * f_pad * 4)

    # TODO(synk): for a 0/1 adjacency, streaming A as int8 (v5e/v6e) or bf16/fp8
    # (v7x) is exact and cuts HBM bytes 2-4x; kept f32 here to preserve the
    # module's general (weighted-A) semantics.

    if normalize:
        # Pass 1: D = rsqrt(rowsum(A) + 1) and XDTheta = D * (X @ W).
        d_full, xdt = pl.pallas_call(
            _prep_norm_kernel,
            out_shape=(jax.ShapeDtypeStruct((n_pad, 1), jnp.float32),
                       jax.ShapeDtypeStruct((n_pad, f_pad), jnp.float32)),
            grid_spec=pltpu.PrefetchScalarGridSpec(
                num_scalar_prefetch=0,
                grid=(n_rows, n_k),
                in_specs=[
                    pl.BlockSpec((tm_, tk_), lambda i, k: (i, k)),     # A tile
                    pl.BlockSpec((tm_, f_in), lambda i, k: (i, 0)),    # X row tile
                    pl.BlockSpec((f_in, f_pad), lambda i, k: (0, 0)),  # W (resident)
                ],
                out_specs=[
                    pl.BlockSpec((tm_, 1), lambda i, k: (i, 0)),       # D
                    pl.BlockSpec((tm_, f_pad), lambda i, k: (i, 0)),   # XDTheta
                ],
                scratch_shapes=[pltpu.VMEM((tm_, 1), jnp.float32)],
            ),
            compiler_params=pltpu.CompilerParams(
                dimension_semantics=("parallel", "arbitrary"),
                vmem_limit_bytes=vmem_limit),
        )(A_p, X_p, W_p)

        # Pass 2: Y = D * (A @ XDTheta + XDTheta) + bias, streamed over A tiles.
        out_p = pl.pallas_call(
            _stream_norm_kernel,
            out_shape=jax.ShapeDtypeStruct((n_pad, f_pad), jnp.float32),
            grid_spec=pltpu.PrefetchScalarGridSpec(
                num_scalar_prefetch=0,
                grid=(n_rows, n_k),
                in_specs=[
                    pl.BlockSpec((tm_, tk_), lambda i, k: (i, k)),     # A tile
                    pl.BlockSpec((tk_, f_pad), lambda i, k: (k, 0)),   # XDTheta (k block)
                    pl.BlockSpec((tm_, f_pad), lambda i, k: (i, 0)),   # XDTheta (self-loop)
                    pl.BlockSpec((tm_, 1), lambda i, k: (i, 0)),       # D
                    pl.BlockSpec((1, f_pad), lambda i, k: (0, 0)),     # bias
                ],
                out_specs=pl.BlockSpec((tm_, f_pad), lambda i, k: (i, 0)),
                scratch_shapes=[pltpu.VMEM((tm_, f_pad), jnp.float32)],
            ),
            compiler_params=pltpu.CompilerParams(
                dimension_semantics=("parallel", "arbitrary"),
                vmem_limit_bytes=vmem_limit),
            cost_estimate=cost,
        )(A_p, xdt, xdt, d_full, b_p)
    else:
        # Pass 1: XTheta = X @ W (no degree pass needed).
        xt = pl.pallas_call(
            _prep_nonorm_kernel,
            out_shape=jax.ShapeDtypeStruct((n_pad, f_pad), jnp.float32),
            grid_spec=pltpu.PrefetchScalarGridSpec(
                num_scalar_prefetch=0,
                grid=(n_rows,),
                in_specs=[
                    pl.BlockSpec((tm_, f_in), lambda i: (i, 0)),
                    pl.BlockSpec((f_in, f_pad), lambda i: (0, 0)),
                ],
                out_specs=pl.BlockSpec((tm_, f_pad), lambda i: (i, 0)),
            ),
            compiler_params=pltpu.CompilerParams(
                dimension_semantics=("parallel",),
                vmem_limit_bytes=vmem_limit),
        )(X_p, W_p)

        # Pass 2: Y = A @ XTheta + bias.
        out_p = pl.pallas_call(
            _stream_nonorm_kernel,
            out_shape=jax.ShapeDtypeStruct((n_pad, f_pad), jnp.float32),
            grid_spec=pltpu.PrefetchScalarGridSpec(
                num_scalar_prefetch=0,
                grid=(n_rows, n_k),
                in_specs=[
                    pl.BlockSpec((tm_, tk_), lambda i, k: (i, k)),
                    pl.BlockSpec((tk_, f_pad), lambda i, k: (k, 0)),
                    pl.BlockSpec((1, f_pad), lambda i, k: (0, 0)),
                ],
                out_specs=pl.BlockSpec((tm_, f_pad), lambda i, k: (i, 0)),
                scratch_shapes=[pltpu.VMEM((tm_, f_pad), jnp.float32)],
            ),
            compiler_params=pltpu.CompilerParams(
                dimension_semantics=("parallel", "arbitrary"),
                vmem_limit_bytes=vmem_limit),
            cost_estimate=cost,
        )(A_p, xt, b_p)

    return out_p[:N, :f_out]


def gcn_conv_reference(A, X, weights, bias, normalize=True):
    """Pure-JAX reference mirroring the PyTorch forward_dense."""
    if X.ndim == 1:
        X = X[:, None]
    if normalize:
        row_sum = A.sum(axis=1)
        D = (row_sum + 1.0) ** (-0.5)
        XTheta = X @ weights
        XDTheta = D[:, None] * XTheta
        Xprime = D[:, None] * (A @ XDTheta + XDTheta)
    else:
        Xprime = A @ (X @ weights)
    return Xprime + bias


if __name__ == "__main__":
    def make_problem(key, n, f_in, f_out):
        k_a, k_x, k_w, k_b = jax.random.split(key, 4)
        A = (jax.random.uniform(k_a, (n, n), dtype=jnp.float32) > 0.8).astype(jnp.float32)
        X = jax.random.normal(k_x, (n, f_in), dtype=jnp.float32)
        W = jax.random.normal(k_w, (f_in, f_out), dtype=jnp.float32)
        b = jax.random.normal(k_b, (f_out,), dtype=jnp.float32)
        return A, X, W, b

    # Case 1: small single-tile path (N=64 padded to 128), normalize=True.
    A, X, W, b = make_problem(jax.random.PRNGKey(0), 64, 16, 8)
    y = jax.block_until_ready(gcn_conv(A, X, W, b, normalize=True))
    y_ref = gcn_conv_reference(A, X, W, b, normalize=True)
    assert y.shape == (64, 8)
    assert jnp.allclose(y, y_ref, atol=2e-3, rtol=2e-3), "normalize=True mismatch"

    # Case 2: multi-tile (row, k) grid with accumulator (N=320 -> 3x3 grid of 128-tiles).
    A2, X2, W2, b2 = make_problem(jax.random.PRNGKey(1), 320, 16, 8)
    y2 = jax.block_until_ready(gcn_conv(A2, X2, W2, b2, normalize=True, tm=128, tk=128))
    y2_ref = gcn_conv_reference(A2, X2, W2, b2, normalize=True)
    assert y2.shape == (320, 8)
    assert jnp.allclose(y2, y2_ref, atol=2e-3, rtol=2e-3), "tiled normalize=True mismatch"

    # Case 3: normalize=False path.
    y3 = jax.block_until_ready(gcn_conv(A, X, W, b, normalize=False))
    y3_ref = gcn_conv_reference(A, X, W, b, normalize=False)
    assert jnp.allclose(y3, y3_ref, atol=2e-3, rtol=2e-3), "normalize=False mismatch"

    print("KERNEL_OK")
</pallas_src>

<mosaic_0001>
module attributes {stable_mosaic.version = 11 : i64} {
  func.func @_prep_norm_kernel(%arg0: i32, %arg1: i32, %arg2: memref<128x128xf32, #tpu.memory_space<vmem>>, %arg3: memref<128x16xf32, #tpu.memory_space<vmem>>, %arg4: memref<16x128xf32, #tpu.memory_space<vmem>>, %arg5: memref<128x1xf32, #tpu.memory_space<vmem>>, %arg6: memref<128x128xf32, #tpu.memory_space<vmem>>, %arg7: memref<128x1xf32, #tpu.memory_space<vmem>>) attributes {dimension_semantics = [#tpu.dimension_semantics<parallel>, #tpu.dimension_semantics<arbitrary>], iteration_bounds = array<i64: 1, 1>, scalar_prefetch = 0 : i64, scratch_operands = 1 : i64, tpu.core_type = #tpu.core_type<tc>, window_params = [{transform_indices = @transform_0, window_bounds = array<i64: 128, 128>}, {transform_indices = @transform_1, window_bounds = array<i64: 128, 16>}, {pipeline_mode = #tpu.pipeline_mode<synchronous>, transform_indices = @transform_2, window_bounds = array<i64: 16, 128>}, {transform_indices = @transform_3, window_bounds = array<i64: 128, 1>}, {transform_indices = @transform_4, window_bounds = array<i64: 128, 128>}]} {
    %c0_i32 = arith.constant 0 : i32
    %0 = arith.cmpi eq, %arg1, %c0_i32 : i32
    %1 = arith.extui %0 : i1 to i32
    %c0_i32_0 = arith.constant 0 : i32
    %2 = arith.cmpi ne, %1, %c0_i32_0 : i32
    scf.if %2 {
      %cst_8 = arith.constant 0.000000e+00 : f32
      %12 = vector.broadcast %cst_8 : f32 to vector<128x1xf32>
      %c0_9 = arith.constant 0 : index
      %c0_10 = arith.constant 0 : index
      %13 = vector.load %arg7[%c0_9, %c0_10] : memref<128x1xf32, #tpu.memory_space<vmem>>, vector<128x1xf32>
      tpu.vector_store %arg7[%c0_9, %c0_10], %12 {strides = array<i32>} : memref<128x1xf32, #tpu.memory_space<vmem>>, vector<128x1xf32>,
    } else {
    }
    %c0 = arith.constant 0 : index
    %c0_1 = arith.constant 0 : index
    %3 = vector.load %arg7[%c0, %c0_1] : memref<128x1xf32, #tpu.memory_space<vmem>>, vector<128x1xf32>
    %c0_2 = arith.constant 0 : index
    %c0_3 = arith.constant 0 : index
    %4 = vector.load %arg2[%c0_2, %c0_3] : memref<128x128xf32, #tpu.memory_space<vmem>>, vector<128x128xf32>
    %cst = arith.constant dense<0.000000e+00> : vector<128xf32>
    %5 = vector.multi_reduction <add>, %4, %cst [1] : vector<128x128xf32> to vector<128xf32>
    %6 = vector.shape_cast %5 : vector<128xf32> to vector<128x1xf32>
    %7 = arith.addf %3, %6 : vector<128x1xf32>
    %c0_4 = arith.constant 0 : index
    %c0_5 = arith.constant 0 : index
    %8 = vector.load %arg7[%c0_4, %c0_5] : memref<128x1xf32, #tpu.memory_space<vmem>>, vector<128x1xf32>
    tpu.vector_store %arg7[%c0_4, %c0_5], %7 {strides = array<i32>} : memref<128x1xf32, #tpu.memory_space<vmem>>, vector<128x1xf32>,
    %c0_i32_6 = arith.constant 0 : i32
    %9 = arith.cmpi eq, %arg1, %c0_i32_6 : i32
    %10 = arith.extui %9 : i1 to i32
    %c0_i32_7 = arith.constant 0 : i32
    %11 = arith.cmpi ne, %10, %c0_i32_7 : i32
    scf.if %11 {
      %c0_8 = arith.constant 0 : index
      %c0_9 = arith.constant 0 : index
      %12 = vector.load %arg7[%c0_8, %c0_9] : memref<128x1xf32, #tpu.memory_space<vmem>>, vector<128x1xf32>
      %cst_10 = arith.constant 1.000000e+00 : f32
      %13 = vector.broadcast %cst_10 : f32 to vector<128x1xf32>
      %14 = arith.addf %12, %13 : vector<128x1xf32>
      %15 = math.rsqrt %14 : vector<128x1xf32>
      %c0_11 = arith.constant 0 : index
      %c0_12 = arith.constant 0 : index
      %16 = vector.load %arg5[%c0_11, %c0_12] : memref<128x1xf32, #tpu.memory_space<vmem>>, vector<128x1xf32>
      tpu.vector_store %arg5[%c0_11, %c0_12], %15 {strides = array<i32>} : memref<128x1xf32, #tpu.memory_space<vmem>>, vector<128x1xf32>,
      %c0_13 = arith.constant 0 : index
      %c0_14 = arith.constant 0 : index
      %17 = vector.load %arg3[%c0_13, %c0_14] : memref<128x16xf32, #tpu.memory_space<vmem>>, vector<128x16xf32>
      %c0_15 = arith.constant 0 : index
      %c0_16 = arith.constant 0 : index
      %18 = vector.load %arg4[%c0_15, %c0_16] : memref<16x128xf32, #tpu.memory_space<vmem>>, vector<16x128xf32>
      %cst_17 = arith.constant dense<0.000000e+00> : vector<128x128xf32>
      %19 = tpu.matmul %17, %18, %cst_17 {dimension_numbers = #tpu.dot_dimension_numbers<[1], [0], [0], [1], [0, 0, 1, 1], [], []>} : vector<128x16xf32>, vector<16x128xf32>, vector<128x128xf32> -> vector<128x128xf32>
      %20 = vector.broadcast %15 : vector<128x1xf32> to vector<128x128xf32>
      %21 = arith.mulf %20, %19 : vector<128x128xf32>
      %c0_18 = arith.constant 0 : index
      %c0_19 = arith.constant 0 : index
      %22 = vector.load %arg6[%c0_18, %c0_19] : memref<128x128xf32, #tpu.memory_space<vmem>>, vector<128x128xf32>
      tpu.vector_store %arg6[%c0_18, %c0_19], %21 {strides = array<i32>} : memref<128x128xf32, #tpu.memory_space<vmem>>, vector<128x128xf32>,
    } else {
    }
    return
  }
  func.func @transform_0(%arg0: i32, %arg1: i32) -> (i32, i32) {
    %c0_i32 = arith.constant 0 : i32
    return %arg0, %arg1 : i32, i32
  }
  func.func @transform_1(%arg0: i32, %arg1: i32) -> (i32, i32) {
    %c0_i32 = arith.constant 0 : i32
    %c0_i32_0 = arith.constant 0 : i32
    return %arg0, %c0_i32 : i32, i32
  }
  func.func @transform_2(%arg0: i32, %arg1: i32) -> (i32, i32) {
    %c0_i32 = arith.constant 0 : i32
    %c0_i32_0 = arith.constant 0 : i32
    %c0_i32_1 = arith.constant 0 : i32
    return %c0_i32, %c0_i32_0 : i32, i32
  }
  func.func @transform_3(%arg0: i32, %arg1: i32) -> (i32, i32) {
    %c0_i32 = arith.constant 0 : i32
    %c0_i32_0 = arith.constant 0 : i32
    return %arg0, %c0_i32 : i32, i32
  }
  func.func @transform_4(%arg0: i32, %arg1: i32) -> (i32, i32) {
    %c0_i32 = arith.constant 0 : i32
    %c0_i32_0 = arith.constant 0 : i32
    return %arg0, %c0_i32 : i32, i32
  }
}

</mosaic_0001>

<bundles_post_ra>
// kernel: tpu_custom_call.1
= control target key start
LH: loop header
LB: loop body
LE: loop exit
PB: predicated region body
PF: predicated region fallthrough
CT: control target
= control target key end

     0   :  { %s1116_s0 = inlined_call_operand.vmem [shape: f32[128,128], index: 0, kind: input, shape index: {}]   ;;  %s1117_s1 = inlined_call_operand.vmem [shape: f32[128,16], index: 1, kind: input, shape index: {}]   ;;  %s1118_s2 = inlined_call_operand.vmem [shape: f32[16,128], index: 2, kind: input, shape index: {}]   ;;  %s1119_s3 = inlined_call_operand.vmem [shape: f32[128,1], index: 3, kind: output, shape index: {0}]   ;;  %s1120_s4 = inlined_call_operand.hbm [shape: f32[128,128], index: 4, kind: output, shape index: {1}]  }
   0x1   :  { %v58_v0 = vld [vmem:[%s1116_s0 + $0x20] sm:$0xff]  ;;  %v56_v2 = vld [vmem:[%s1116_s0 + $0x10] sm:$0xff] }
   0x2   :  { %v54_v1 = vld [vmem:[%s1116_s0] sm:$0xff]  ;;  %78 = vadd.xlane.f32.xlu2 %v58_v0  ;;  %74 = vadd.xlane.f32.xlu1 %v56_v2 }
   0x3   :  { %70 = vadd.xlane.f32.xlu0 %v54_v1 }
   0x4   :  { %10 = vsyncpa [#allocation4], 0  ;;  %v59_v3 = vld [vmem:[%s1116_s0 + $0x28] sm:$0xff]  ;;  %v57_v5 = vld [vmem:[%s1116_s0 + $0x18] sm:$0xff]  ;;  %vm364_vm0 = vcmask 130048   ;;  %vm21_vm1 = vcmask 7168  }
   0x5   :  { %v55_v4 = vld [vmem:[%s1116_s0 + $0x8] sm:$0xff]  ;;  %v362_v7 = vld [vmem:[%s1118_s2] sm:$0xff]  ;;  %v60_v10 = vld [vmem:[%s1116_s0 + $0x30] sm:$0xff]  ;;  %v700_v20 = vmov 0.0   ;;  %v701_v31 = vmov 0   ;;  %s598_s6 = sshll.u32 %s1120_s4, 4  ;;  %s599_s6 = int_to_ptr.hbm [resolvable:$true] %s598_s6 }
   0x6   :  { %v363_v6 = vld [vmem:[%s1118_s2 + $0x8] sm:$0xff]  ;;  %v346_v8 = vld [vmem:[%s1117_s1] sm:$0xff]  ;;  %v61_v11 = vld [vmem:[%s1116_s0 + $0x38] sm:$0xff]  ;;  %26 = vst.msk [vmem:[#allocation2 + $0x20] sm:$0xff] %vm21_vm1, %v700_v20  ;;  %639 = vset.pattern.permute.xlu1 %v701_v31  ;;  %641 = vset.pattern.permute.xlu0 %v701_v31  ;;  %s703_s7 = smov 128   ;;  %s704_s8 = smov 8  }
   0x7   :  { %427 = vmatpush.msra.mxu0 %v363_v6  ;;  %628 = vmatpush.msra.mxu1 %v363_v6  ;;  %v62_v9 = vld [vmem:[%s1116_s0 + $0x40] sm:$0xff]  ;;  %v347_v12 = vld [vmem:[%s1117_s1 + $0x8] sm:$0xff]  ;;  %v65_v13 = vld [vmem:[%s1116_s0 + $0x58] sm:$0xff]  ;;  %22 = vst.msk [vmem:[#allocation2] sm:$0xff] %vm21_vm1, %v700_v20 }
   0x8   :  { %629 = vmatpush.msra.mxu2 %v363_v6  ;;  %630 = vmatpush.msra.mxu3 %v363_v6  ;;  %v63_v14 = vld [vmem:[%s1116_s0 + $0x48] sm:$0xff]  ;;  %v64_v15 = vld [vmem:[%s1116_s0 + $0x50] sm:$0xff]  ;;  %v66_v17 = vld [vmem:[%s1116_s0 + $0x60] sm:$0xff]  ;;  %23 = vst.msk [vmem:[#allocation2 + $0x8] sm:$0xff] %vm21_vm1, %v700_v20 }
   0x9   :  { %428 = vmatpush.msra.mxu0 %v362_v7  ;;  %631 = vmatpush.msra.mxu1 %v362_v7  ;;  %v68_v16 = vld [vmem:[%s1116_s0 + $0x70] sm:$0xff]  ;;  %v67_v18 = vld [vmem:[%s1116_s0 + $0x68] sm:$0xff]  ;;  %v69_v19 = vld [vmem:[%s1116_s0 + $0x78] sm:$0xff]  ;;  %24 = vst.msk [vmem:[#allocation2 + $0x10] sm:$0xff] %vm21_vm1, %v700_v20 }
   0xa   :  { %80 = vadd.xlane.f32.xlu2 %v59_v3  ;;  %76 = vadd.xlane.f32.xlu1 %v57_v5  ;;  %25 = vst.msk [vmem:[#allocation2 + $0x18] sm:$0xff] %vm21_vm1, %v700_v20  ;;  %v350_v21 = vld [vmem:[%s1117_s1 + $0x20] sm:$0xff]  ;;  %v348_v22 = vld [vmem:[%s1117_s1 + $0x10] sm:$0xff]  ;;  %v351_v23 = vld [vmem:[%s1117_s1 + $0x28] sm:$0xff] }
   0xb   :  { %72 = vadd.xlane.f32.xlu0 %v55_v4  ;;  %612 = vmatmul.msk.f32.vlgmr.msra.gmra.mxu0 %vm364_vm0, %v346_v8  ;;  %27 = vst.msk [vmem:[#allocation2 + $0x28] sm:$0xff] %vm21_vm1, %v700_v20  ;;  %v349_v24 = vld [vmem:[%s1117_s1 + $0x18] sm:$0xff]  ;;  %v354_v25 = vld [vmem:[%s1117_s1 + $0x40] sm:$0xff]  ;;  %v352_v26 = vld [vmem:[%s1117_s1 + $0x30] sm:$0xff] }
   0xc   :  { %632 = vmatpush.msra.mxu2 %v362_v7  ;;  %633 = vmatpush.msra.mxu3 %v362_v7  ;;  %28 = vst.msk [vmem:[#allocation2 + $0x30] sm:$0xff] %vm21_vm1, %v700_v20  ;;  %v355_v27 = vld [vmem:[%s1117_s1 + $0x48] sm:$0xff]  ;;  %v353_v28 = vld [vmem:[%s1117_s1 + $0x38] sm:$0xff]  ;;  %v356_v29 = vld [vmem:[%s1117_s1 + $0x50] sm:$0xff] }
   0xd   :  { %29 = vst.msk [vmem:[#allocation2 + $0x38] sm:$0xff] %vm21_vm1, %v700_v20  ;;  %616 = vmatmul.msk.f32.vlgmr.msra.gmra.mxu1 %vm364_vm0, %v350_v21  ;;  %620 = vmatmul.msk.f32.vlgmr.msra.gmra.mxu2 %vm364_vm0, %v354_v25  ;;  %v358_v30 = vld [vmem:[%s1117_s1 + $0x60] sm:$0xff]  ;;  %v359_v41 = vld [vmem:[%s1117_s1 + $0x68] sm:$0xff]  ;;  %v357_v54 = vld [vmem:[%s1117_s1 + $0x58] sm:$0xff] }
   0xe   :  { %30 = vst.msk [vmem:[#allocation2 + $0x40] sm:$0xff] %vm21_vm1, %v700_v20  ;;  %v42_v32 = vld [vmem:[#allocation2 + $0x20] sm:$0xff]  ;;  %624 = vmatmul.msk.f32.vlgmr.msra.gmra.mxu3 %vm364_vm0, %v358_v30  ;;  %640 = vset.pattern.permute.xlu2 %v701_v31  ;;  %v360_v55 = vld [vmem:[%s1117_s1 + $0x70] sm:$0xff]  ;;  %v361_v7 = vld [vmem:[%s1117_s1 + $0x78] sm:$0xff] }
   0xf   :  { %31 = vst.msk [vmem:[#allocation2 + $0x48] sm:$0xff] %vm21_vm1, %v700_v20  ;;  %v38_v33 = vld [vmem:[#allocation2] sm:$0xff]  ;;  %v39_v43 = vld [vmem:[#allocation2 + $0x8] sm:$0xff] }
  0x10   :  { %32 = vst.msk [vmem:[#allocation2 + $0x50] sm:$0xff] %vm21_vm1, %v700_v20  ;;  %v40_v34 = vld [vmem:[#allocation2 + $0x10] sm:$0xff] }
  0x11   :  { %33 = vst.msk [vmem:[#allocation2 + $0x58] sm:$0xff] %vm21_vm1, %v700_v20  ;;  %v41_v44 = vld [vmem:[#allocation2 + $0x18] sm:$0xff] }
  0x12   :  { %86 = vadd.xlane.f32.xlu2 %v62_v9  ;;  %84 = vadd.xlane.f32.xlu1 %v61_v11  ;;  %34 = vst.msk [vmem:[#allocation2 + $0x60] sm:$0xff] %vm21_vm1, %v700_v20  ;;  %v43_v42 = vld [vmem:[#allocation2 + $0x28] sm:$0xff] }
  0x13   :  { %82 = vadd.xlane.f32.xlu0 %v60_v10  ;;  %613 = vmatmul.msk.f32.gmra.mxu0 %vm364_vm0, %v347_v12  ;;  %35 = vst.msk [vmem:[#allocation2 + $0x68] sm:$0xff] %vm21_vm1, %v700_v20  ;;  %v44_v60 = vld [vmem:[#allocation2 + $0x30] sm:$0xff] }
  0x14   :  { %36 = vst.msk [vmem:[#allocation2 + $0x70] sm:$0xff] %vm21_vm1, %v700_v20  ;;  %v45_v61 = vld [vmem:[#allocation2 + $0x38] sm:$0xff] }
  0x15   :  { %37 = vst.msk [vmem:[#allocation2 + $0x78] sm:$0xff] %vm21_vm1, %v700_v20  ;;  %617 = vmatmul.msk.f32.gmra.mxu1 %vm364_vm0, %v351_v23  ;;  %621 = vmatmul.msk.f32.gmra.mxu2 %vm364_vm0, %v355_v27  ;;  %v46_v59 = vld [vmem:[#allocation2 + $0x40] sm:$0xff] }
  0x16   :  { %625 = vmatmul.msk.f32.gmra.mxu3 %vm364_vm0, %v359_v41 }
  0x17   :  { %v48_v21 = vld [vmem:[#allocation2 + $0x50] sm:$0xff] }
  0x1a   :  { %92 = vadd.xlane.f32.xlu2 %v65_v13  ;;  %90 = vadd.xlane.f32.xlu1 %v64_v15 }
  0x1b   :  { %88 = vadd.xlane.f32.xlu0 %v63_v14  ;;  %614 = vmatmul.msk.f32.gmra.mxu0 %vm364_vm0, %v348_v22 }
  0x1d   :  { %618 = vmatmul.msk.f32.gmra.mxu1 %vm364_vm0, %v352_v26  ;;  %622 = vmatmul.msk.f32.gmra.mxu2 %vm364_vm0, %v356_v29 }
  0x1e   :  { %626 = vmatmul.msk.f32.gmra.mxu3 %vm364_vm0, %v360_v55  ;;  %v51_v55 = vld [vmem:[#allocation2 + $0x68] sm:$0xff] }
  0x22   :  { %98 = vadd.xlane.f32.xlu2 %v68_v16  ;;  %96 = vadd.xlane.f32.xlu1 %v67_v18  ;;  %v49_v16 = vld [vmem:[#allocation2 + $0x58] sm:$0xff] }
  0x23   :  { %94 = vadd.xlane.f32.xlu0 %v66_v17  ;;  %615 = vmatmul.msk.f32.gmra.mxu0 %vm364_vm0, %v349_v24  ;;  %v47_v17 = vld [vmem:[#allocation2 + $0x48] sm:$0xff] }
  0x25   :  { %619 = vmatmul.msk.f32.gmra.mxu1 %vm364_vm0, %v353_v28  ;;  %623 = vmatmul.msk.f32.gmra.mxu2 %vm364_vm0, %v357_v54 }
  0x26   :  { %627 = vmatmul.msk.f32.gmra.mxu3 %vm364_vm0, %v361_v7 }
  0x2b   :  { %100 = vadd.xlane.f32.xlu0 %v69_v19 }
  0x75   :  { %v79_v35 = vpop.xlane.xlu2 %78  ;;  %v75_v39 = vpop.xlane.xlu1 %74 }
  0x76   :  { %v71_v36 = vpop.xlane.xlu0 %70  ;;  %v106_v37 = vadd.f32 %v79_v35, %v42_v32  ;;  %v104_v40 = vadd.f32 %v75_v39, %v40_v34 }
  0x77   :  { %v102_v38 = vadd.f32 %v71_v36, %v38_v33 }
  0x78   :  { %123 = vst.msk [vmem:[#allocation2 + $0x20] sm:$0xff] %vm21_vm1, %v106_v37 }
  0x79   :  { %119 = vst.msk [vmem:[#allocation2] sm:$0xff] %vm21_vm1, %v102_v38 }
  0x7a   :  { %121 = vst.msk [vmem:[#allocation2 + $0x10] sm:$0xff] %vm21_vm1, %v104_v40 }
  0x7d   :  { %v81_v45 = vpop.xlane.xlu2 %80  ;;  %v77_v49 = vpop.xlane.xlu1 %76 }
  0x7e   :  { %v73_v46 = vpop.xlane.xlu0 %72  ;;  %v107_v47 = vadd.f32 %v81_v45, %v43_v42  ;;  %v105_v50 = vadd.f32 %v77_v49, %v41_v44  ;;  %v50_v49 = vld [vmem:[#allocation2 + $0x60] sm:$0xff] }
  0x7f   :  { %v103_v48 = vadd.f32 %v73_v46, %v39_v43  ;;  %v142_v51 = vld [vmem:[#allocation2 + $0x20] sm:$0xff] }
  0x80   :  { %124 = vst.msk [vmem:[#allocation2 + $0x28] sm:$0xff] %vm21_vm1, %v107_v47  ;;  %v138_v52 = vld [vmem:[#allocation2] sm:$0xff]  ;;  %v856_v53 = vadd.f32 1.0, %v142_v51 }
  0x81   :  { %120 = vst.msk [vmem:[#allocation2 + $0x8] sm:$0xff] %vm21_vm1, %v103_v48  ;;  %v865_v56 = vadd.f32 1.0, %v138_v52  ;;  %v140_v57 = vld [vmem:[#allocation2 + $0x10] sm:$0xff] }
  0x82   :  { %122 = vst.msk [vmem:[#allocation2 + $0x18] sm:$0xff] %vm21_vm1, %v105_v50  ;;  %v869_v58 = vadd.f32 1.0, %v140_v57  ;;  %642 = vrsqrt.f32 %v856_v53  ;;  %vm216_vm2 = vweird.f32 %v856_v53  ;;  %v52_v48 = vld [vmem:[#allocation2 + $0x70] sm:$0xff] }
  0x83   :  { %644 = vrsqrt.f32 %v865_v56  ;;  %vm176_vm8 = vweird.f32 %v865_v56 }
  0x84   :  { %646 = vrsqrt.f32 %v869_v58  ;;  %vm196_vm4 = vweird.f32 %v869_v58 }
  0x85   :  { %v87_v62 = vpop.xlane.xlu2 %86  ;;  %v85_v2 = vpop.xlane.xlu1 %84 }
  0x86   :  { %v83_v63 = vpop.xlane.xlu0 %82  ;;  %v110_v0 = vadd.f32 %v87_v62, %v46_v59  ;;  %v109_v3 = vadd.f32 %v85_v2, %v45_v61 }
  0x87   :  { %v108_v1 = vadd.f32 %v83_v63, %v44_v60  ;;  %v143_v4 = vld [vmem:[#allocation2 + $0x28] sm:$0xff] }
  0x88   :  { %v875_v5 = vpop.eup %642  ;;  %127 = vst.msk [vmem:[#allocation2 + $0x40] sm:$0xff] %vm21_vm1, %v110_v0  ;;  %v139_v6 = vld [vmem:[#allocation2 + $0x8] sm:$0xff]  ;;  %v881_v8 = vadd.f32 1.0, %v143_v4 }
  0x89   :  { %v645_v9 = vpop.eup %644  ;;  %125 = vst.msk [vmem:[#allocation2 + $0x30] sm:$0xff] %vm21_vm1, %v108_v1  ;;  %v884_v10 = vadd.f32 1.0, %v139_v6  ;;  %v211_v11 = vmul.f32 %v875_v5, %v856_v53  ;;  %v141_v12 = vld [vmem:[#allocation2 + $0x18] sm:$0xff]  ;;  %vm217_vm3 = vweird.f32 %v875_v5 }
  0x8a   :  { %v888_v13 = vpop.eup %646  ;;  %v171_v14 = vmul.f32 %v645_v9, %v865_v56  ;;  %126 = vst.msk [vmem:[#allocation2 + $0x38] sm:$0xff] %vm21_vm1, %v109_v3  ;;  %v892_v15 = vadd.f32 1.0, %v141_v12  ;;  %648 = vrsqrt.f32 %v881_v8  ;;  %vm177_vm6 = vweird.f32 %v645_v9  ;;  %vm916_vm7 = vmor %vm216_vm2, %vm217_vm3 }
  0x8b   :  { %v191_v18 = vmul.f32 %v888_v13, %v869_v58  ;;  %650 = vrsqrt.f32 %v884_v10  ;;  %v212_v20 = vmul.f32 %v875_v5, %v211_v11  ;;  %vm197_vm5 = vweird.f32 %v888_v13  ;;  %vm178_vm10 = vmor %vm176_vm8, %vm177_vm6 }
  0x8c   :  { %v172_v19 = vmul.f32 %v645_v9, %v171_v14  ;;  %652 = vrsqrt.f32 %v892_v15  ;;  %vm933_vm9 = vmor %vm196_vm4, %vm197_vm5  ;;  %vm206_vm11 = vweird.f32 %v892_v15  ;;  %vm226_vm12 = vweird.f32 %v881_v8 }
  0x8d   :  { %v93_v22 = vpop.xlane.xlu2 %92  ;;  %v192_v24 = vmul.f32 %v888_v13, %v191_v18  ;;  %v213_v28 = vmul.f32 0.5, %v212_v20  ;;  %v91_v29 = vpop.xlane.xlu1 %90  ;;  %vm186_vm0 = vweird.f32 %v884_v10 }
  0x8e   :  { %v89_v23 = vpop.xlane.xlu0 %88  ;;  %v113_v25 = vadd.f32 %v93_v22, %v49_v16  ;;  %v173_v27 = vmul.f32 0.5, %v172_v19  ;;  %v112_v31 = vadd.f32 %v91_v29, %v48_v21  ;;  %v53_v21 = vld [vmem:[#allocation2 + $0x78] sm:$0xff] }
  0x8f   :  { %v111_v26 = vadd.f32 %v89_v23, %v47_v17  ;;  %v193_v30 = vmul.f32 0.5, %v192_v24  ;;  %v146_v32 = vld [vmem:[#allocation2 + $0x40] sm:$0xff]  ;;  %v214_v35 = vsub.f32 1.5, %v213_v28 }
  0x90   :  { %v906_v33 = vpop.eup %648  ;;  %130 = vst.msk [vmem:[#allocation2 + $0x58] sm:$0xff] %vm21_vm1, %v113_v25  ;;  %v174_v34 = vsub.f32 1.5, %v173_v27  ;;  %v144_v36 = vld [vmem:[#allocation2 + $0x30] sm:$0xff]  ;;  %v924_v42 = vadd.f32 1.0, %v146_v32 }
  0x91   :  { %v909_v37 = vpop.eup %650  ;;  %128 = vst.msk [vmem:[#allocation2 + $0x48] sm:$0xff] %vm21_vm1, %v111_v26  ;;  %v194_v38 = vsub.f32 1.5, %v193_v30  ;;  %v920_v40 = vadd.f32 1.0, %v144_v36  ;;  %v221_v41 = vmul.f32 %v906_v33, %v881_v8  ;;  %v215_v47 = vmul.f32 %v875_v5, %v214_v35  ;;  %v145_v56 = vld [vmem:[#allocation2 + $0x38] sm:$0xff] }
  0x92   :  { %v926_v43 = vpop.eup %652  ;;  %v175_v44 = vmul.f32 %v645_v9, %v174_v34  ;;  %v181_v46 = vmul.f32 %v909_v37, %v884_v10  ;;  %129 = vst.msk [vmem:[#allocation2 + $0x50] sm:$0xff] %vm21_vm1, %v112_v31  ;;  %vm187_vm14 = vweird.f32 %v909_v37  ;;  %vm227_vm15 = vweird.f32 %v906_v33 }
  0x93   :  { %v195_v50 = vmul.f32 %v888_v13, %v194_v38  ;;  %v201_v51 = vmul.f32 %v926_v43, %v892_v15  ;;  %654 = vrsqrt.f32 %v920_v40  ;;  %v219_v54 = vsel %vm916_vm7, %v875_v5, %v215_v47  ;;  %vm188_vm3 = vmor %vm186_vm0, %vm187_vm14 }
  0x94   :  { %v179_v52 = vsel %vm178_vm10, %v645_v9, %v175_v44  ;;  %v182_v53 = vmul.f32 %v909_v37, %v181_v46  ;;  %v222_v61 = vmul.f32 %v906_v33, %v221_v41  ;;  %656 = vrsqrt.f32 %v924_v42  ;;  %334 = vst.msk [vmem:[%s1119_s3 + $0x20] sm:$0xff] %vm21_vm1, %v219_v54  ;;  %vm228_vm4 = vmor %vm226_vm12, %vm227_vm15 }
  0x95   :  { %480 = vperm.xlu1 %639, %v179_v52   ;;  %330 = vst.msk [vmem:[%s1119_s3] sm:$0xff] %vm21_vm1, %v179_v52  ;;  %v99_v57 = vpop.xlane.xlu2 %98  ;;  %v199_v59 = vsel %vm933_vm9, %v888_v13, %v195_v50  ;;  %v202_v60 = vmul.f32 %v926_v43, %v201_v51  ;;  %vm207_vm13 = vweird.f32 %v926_v43  ;;  %v97_v1 = vpop.xlane.xlu1 %96  ;;  %v971_v5 = vadd.f32 1.0, %v145_v56 }
  0x96   :  { %v95_v58 = vpop.xlane.xlu0 %94  ;;  %v116_v62 = vadd.f32 %v99_v57, %v52_v48  ;;  %490 = vperm.xlu0 %641, %v199_v59   ;;  %332 = vst.msk [vmem:[%s1119_s3 + $0x10] sm:$0xff] %vm21_vm1, %v199_v59  ;;  %v183_v0 = vmul.f32 0.5, %v182_v53  ;;  %v115_v3 = vadd.f32 %v97_v1, %v51_v55  ;;  %v223_v4 = vmul.f32 0.5, %v222_v61  ;;  %vm988_vm2 = vmor %vm206_vm11, %vm207_vm13 }
  0x97   :  { %v114_v63 = vadd.f32 %v95_v58, %v50_v49  ;;  %v203_v2 = vmul.f32 0.5, %v202_v60  ;;  %v149_v6 = vld [vmem:[#allocation2 + $0x58] sm:$0xff]  ;;  %658 = vrsqrt.f32 %v971_v5  ;;  %vm236_vm5 = vweird.f32 %v920_v40 }
  0x98   :  { %133 = vst.msk [vmem:[#allocation2 + $0x70] sm:$0xff] %vm21_vm1, %v116_v62  ;;  %v184_v7 = vsub.f32 1.5, %v183_v0  ;;  %v147_v9 = vld [vmem:[#allocation2 + $0x48] sm:$0xff]  ;;  %v976_v11 = vadd.f32 1.0, %v149_v6  ;;  %v224_v16 = vsub.f32 1.5, %v223_v4  ;;  %vm256_vm7 = vweird.f32 %v924_v42 }
  0x99   :  { %v655_v12 = vpop.eup %654  ;;  %131 = vst.msk [vmem:[#allocation2 + $0x60] sm:$0xff] %vm21_vm1, %v114_v63  ;;  %v204_v13 = vsub.f32 1.5, %v203_v2  ;;  %v979_v14 = vadd.f32 1.0, %v147_v9  ;;  %v148_v15 = vld [vmem:[#allocation2 + $0x50] sm:$0xff]  ;;  %vm246_vm10 = vweird.f32 %v971_v5 }
  0x9a   :  { %v185_v17 = vmul.f32 %v909_v37, %v184_v7  ;;  %v231_v19 = vmul.f32 %v655_v12, %v920_v40  ;;  %132 = vst.msk [vmem:[#allocation2 + $0x68] sm:$0xff] %vm21_vm1, %v115_v3  ;;  %v657_v20 = vpop.eup %656  ;;  %v225_v10 = vmul.f32 %v906_v33, %v224_v16  ;;  %v1020_v31 = vadd.f32 1.0, %v148_v15 }
  0x9b   :  { %v205_v22 = vmul.f32 %v926_v43, %v204_v13  ;;  %660 = vrsqrt.f32 %v979_v14  ;;  %v251_v25 = vmul.f32 %v657_v20, %v924_v42  ;;  %vm237_vm6 = vweird.f32 %v655_v12 }
  0x9c   :  { %v189_v23 = vsel %vm188_vm3, %v909_v37, %v185_v17  ;;  %v232_v24 = vmul.f32 %v655_v12, %v231_v19  ;;  %v1013_v28 = vsel %vm228_vm4, %v906_v33, %v225_v10  ;;  %662 = vrsqrt.f32 %v976_v11  ;;  %vm238_vm9 = vmor %vm236_vm5, %vm237_vm6 }
  0x9d   :  { %485 = vperm.xlu2 %640, %v189_v23   ;;  %331 = vst.msk [vmem:[%s1119_s3 + $0x8] sm:$0xff] %vm21_vm1, %v189_v23  ;;  %500 = vperm.xlu1 %639, %v219_v54   ;;  %v209_v27 = vsel %vm988_vm2, %v926_v43, %v205_v22  ;;  %v252_v30 = vmul.f32 %v657_v20, %v251_v25  ;;  %v659_v32 = vpop.eup %658  ;;  %664 = vrsqrt.f32 %v1020_v31  ;;  %vm257_vm8 = vweird.f32 %v657_v20 }
  0x9e   :  { %v101_v26 = vpop.xlane.xlu0 %100  ;;  %333 = vst.msk [vmem:[%s1119_s3 + $0x18] sm:$0xff] %vm21_vm1, %v209_v27  ;;  %v233_v29 = vmul.f32 0.5, %v232_v24  ;;  %v241_v37 = vmul.f32 %v659_v32, %v971_v5  ;;  %vm258_vm11 = vmor %vm256_vm7, %vm257_vm8  ;;  %vm247_vm12 = vweird.f32 %v659_v32  ;;  %vm266_vm15 = vweird.f32 %v979_v14 }
  0x9f   :  { %v117_v8 = vadd.f32 %v101_v26, %v53_v21  ;;  %335 = vst.msk [vmem:[%s1119_s3 + $0x28] sm:$0xff] %vm21_vm1, %v1013_v28  ;;  %v152_v33 = vld [vmem:[#allocation2 + $0x70] sm:$0xff]  ;;  %v253_v35 = vmul.f32 0.5, %v252_v30  ;;  %vm248_vm14 = vmor %vm246_vm10, %vm247_vm12  ;;  %vm286_vm0 = vweird.f32 %v976_v11  ;;  %vm276_vm5 = vweird.f32 %v1020_v31 }
  0xa0   :  { %v234_v34 = vsub.f32 1.5, %v233_v29  ;;  %v150_v36 = vld [vmem:[#allocation2 + $0x60] sm:$0xff]  ;;  %v1034_v41 = vadd.f32 1.0, %v152_v33  ;;  %v242_v48 = vmul.f32 %v659_v32, %v241_v37 }
  0xa1   :  { %134 = vst.msk [vmem:[#allocation2 + $0x78] sm:$0xff] %vm21_vm1, %v117_v8  ;;  %v661_v38 = vpop.eup %660  ;;  %v1031_v39 = vadd.f32 1.0, %v150_v36  ;;  %v254_v45 = vsub.f32 1.5, %v253_v35  ;;  %v151_v46 = vld [vmem:[#allocation2 + $0x68] sm:$0xff] }
  0xa2   :  { %v235_v43 = vmul.f32 %v655_v12, %v234_v34  ;;  %v261_v44 = vmul.f32 %v661_v38, %v979_v14  ;;  %v663_v47 = vpop.eup %662  ;;  %v243_v40 = vmul.f32 0.5, %v242_v48  ;;  %v1050_v53 = vadd.f32 1.0, %v151_v46 }
  0xa3   :  { %666 = vrsqrt.f32 %v1031_v39  ;;  %v255_v51 = vmul.f32 %v657_v20, %v254_v45  ;;  %v281_v52 = vmul.f32 %v663_v47, %v976_v11  ;;  %v665_v57 = vpop.eup %664  ;;  %vm267_vm13 = vweird.f32 %v661_v38 }
  0xa4   :  { %v239_v49 = vsel %vm238_vm9, %v655_v12, %v235_v43  ;;  %v262_v50 = vmul.f32 %v661_v38, %v261_v44  ;;  %668 = vrsqrt.f32 %v1034_v41  ;;  %v244_v58 = vsub.f32 1.5, %v243_v40  ;;  %vm268_vm3 = vmor %vm266_vm15, %vm267_vm13  ;;  %v442_v43 = vpop.f32.mrf.mxu1 }
  0xa5   :  { %495 = vperm.xlu2 %640, %v209_v27   ;;  %336 = vst.msk [vmem:[%s1119_s3 + $0x30] sm:$0xff] %vm21_vm1, %v239_v49  ;;  %510 = vperm.xlu1 %639, %v239_v49   ;;  %v259_v55 = vsel %vm258_vm11, %v657_v20, %v255_v51  ;;  %v282_v56 = vmul.f32 %v663_v47, %v281_v52  ;;  %670 = vrsqrt.f32 %v1050_v53  ;;  %vm287_vm2 = vweird.f32 %v663_v47  ;;  %v454_v51 = vpop.f32.mrf.mxu2 }
  0xa6   :  { %v263_v54 = vmul.f32 0.5, %v262_v50  ;;  %338 = vst.msk [vmem:[%s1119_s3 + $0x40] sm:$0xff] %vm21_vm1, %v259_v55  ;;  %v271_v62 = vmul.f32 %v665_v57, %v1020_v31  ;;  %v245_v0 = vmul.f32 %v659_v32, %v244_v58  ;;  %vm288_vm4 = vmor %vm286_vm0, %vm287_vm2  ;;  %vm277_vm6 = vweird.f32 %v665_v57 }
  0xa7   :  { %v283_v60 = vmul.f32 0.5, %v282_v56  ;;  %vm278_vm8 = vmor %vm276_vm5, %vm277_vm6  ;;  %vm296_vm9 = vweird.f32 %v1031_v39  ;;  %vm316_vm10 = vweird.f32 %v1034_v41  ;;  %vm306_vm13 = vweird.f32 %v1050_v53 }
  0xa8   :  { %v153_v59 = vld [vmem:[#allocation2 + $0x78] sm:$0xff]  ;;  %v264_v42 = vsub.f32 1.5, %v263_v54  ;;  %v249_v5 = vsel %vm248_vm14, %v659_v32, %v245_v0  ;;  %v272_v6 = vmul.f32 %v665_v57, %v271_v62 }
  0xa9   :  { %v1059_v61 = vadd.f32 1.0, %v153_v59  ;;  %v667_v63 = vpop.eup %666  ;;  %v284_v3 = vsub.f32 1.5, %v283_v60  ;;  %337 = vst.msk [vmem:[%s1119_s3 + $0x38] sm:$0xff] %vm21_vm1, %v249_v5 }
  0xaa   :  { %v265_v1 = vmul.f32 %v661_v38, %v264_v42  ;;  %v291_v2 = vmul.f32 %v667_v63, %v1031_v39  ;;  %v669_v4 = vpop.eup %668  ;;  %v273_v16 = vmul.f32 0.5, %v272_v6  ;;  %vm297_vm7 = vweird.f32 %v667_v63  ;;  %v430_v39 = vpop.f32.mrf.mxu0 }
  0xab   :  { %672 = vrsqrt.f32 %v1059_v61  ;;  %v285_v12 = vmul.f32 %v663_v47, %v284_v3  ;;  %v311_v13 = vmul.f32 %v669_v4, %v1034_v41  ;;  %v671_v14 = vpop.eup %670  ;;  %vm317_vm11 = vweird.f32 %v669_v4  ;;  %vm298_vm12 = vmor %vm296_vm9, %vm297_vm7  ;;  %v466_v42 = vpop.f32.mrf.mxu3 }
  0xac   :  { %v269_v7 = vsel %vm268_vm3, %v661_v38, %v265_v1  ;;  %v292_v9 = vmul.f32 %v667_v63, %v291_v2  ;;  %v301_v20 = vmul.f32 %v671_v14, %v1050_v53  ;;  %v274_v21 = vsub.f32 1.5, %v273_v16  ;;  %vm318_vm15 = vmor %vm316_vm10, %vm317_vm11 }
  0xad   :  { %339 = vst.msk [vmem:[%s1119_s3 + $0x48] sm:$0xff] %vm21_vm1, %v269_v7  ;;  %525 = vperm.xlu0 %641, %v269_v7   ;;  %505 = vperm.xlu2 %640, %v1013_v28   ;;  %v289_v18 = vsel %vm288_vm4, %v663_v47, %v285_v12  ;;  %v312_v19 = vmul.f32 %v669_v4, %v311_v13  ;;  %vm307_vm14 = vweird.f32 %v671_v14  ;;  %vm326_vm3 = vweird.f32 %v1059_v61  ;;  %v445_v47 = vpop.f32.mrf.mxu1  ;;  %v457_v58 = vpop.f32.mrf.mxu2 }
  0xae   :  { %520 = vperm.xlu1 %639, %v259_v55   ;;  %v293_v17 = vmul.f32 0.5, %v292_v9  ;;  %341 = vst.msk [vmem:[%s1119_s3 + $0x58] sm:$0xff] %vm21_vm1, %v289_v18  ;;  %v302_v10 = vmul.f32 %v671_v14, %v301_v20  ;;  %v275_v23 = vmul.f32 %v665_v57, %v274_v21  ;;  %vm308_vm0 = vmor %vm306_vm13, %vm307_vm14 }
  0xaf   :  { %v313_v11 = vmul.f32 0.5, %v312_v19 }
  0xb0   :  { %v294_v22 = vsub.f32 1.5, %v293_v17  ;;  %v279_v27 = vsel %vm278_vm8, %v665_v57, %v275_v23  ;;  %v303_v28 = vmul.f32 0.5, %v302_v10 }
  0xb1   :  { %v673_v15 = vpop.eup %672  ;;  %v314_v26 = vsub.f32 1.5, %v313_v11  ;;  %340 = vst.msk [vmem:[%s1119_s3 + $0x50] sm:$0xff] %vm21_vm1, %v279_v27 }
  0xb2   :  { %v295_v24 = vmul.f32 %v667_v63, %v294_v22  ;;  %v321_v25 = vmul.f32 %v673_v15, %v1059_v61  ;;  %v304_v31 = vsub.f32 1.5, %v303_v28  ;;  %vm327_vm2 = vweird.f32 %v673_v15  ;;  %v433_v41 = vpop.f32.mrf.mxu0 }
  0xb3   :  { %v315_v30 = vmul.f32 %v669_v4, %v314_v26  ;;  %vm328_vm4 = vmor %vm326_vm3, %vm327_vm2 }
  0xb4   :  { %v299_v8 = vsel %vm298_vm12, %v667_v63, %v295_v24  ;;  %v322_v29 = vmul.f32 %v673_v15, %v321_v25  ;;  %v305_v34 = vmul.f32 %v671_v14, %v304_v31 }
  0xb5   :  { %342 = vst.msk [vmem:[%s1119_s3 + $0x60] sm:$0xff] %vm21_vm1, %v299_v8  ;;  %540 = vperm.xlu0 %641, %v299_v8   ;;  %515 = vperm.xlu2 %640, %v249_v5   ;;  %v319_v33 = vsel %vm318_vm15, %v669_v4, %v315_v30  ;;  %v448_v52 = vpop.f32.mrf.mxu1  ;;  %v460_v0 = vpop.f32.mrf.mxu2 }
  0xb6   :  { %535 = vperm.xlu1 %639, %v289_v18   ;;  %v323_v32 = vmul.f32 0.5, %v322_v29  ;;  %344 = vst.msk [vmem:[%s1119_s3 + $0x70] sm:$0xff] %vm21_vm1, %v319_v33  ;;  %v309_v36 = vsel %vm308_vm0, %v671_v14, %v305_v34  ;;  %v469_v5 = vpop.f32.mrf.mxu3 }
  0xb7   :  { %343 = vst.msk [vmem:[%s1119_s3 + $0x68] sm:$0xff] %vm21_vm1, %v309_v36 }
  0xb8   :  { %v324_v35 = vsub.f32 1.5, %v323_v32 }
  0xba   :  { %v325_v37 = vmul.f32 %v673_v15, %v324_v35  ;;  %v436_v44 = vpop.f32.mrf.mxu0 }
  0xbc   :  { %v329_v38 = vsel %vm328_vm4, %v673_v15, %v325_v37 }
  0xbd   :  { %345 = vst.msk [vmem:[%s1119_s3 + $0x78] sm:$0xff] %vm21_vm1, %v329_v38  ;;  %555 = vperm.xlu0 %641, %v329_v38   ;;  %530 = vperm.xlu2 %640, %v279_v27   ;;  %v451_v59 = vpop.f32.mrf.mxu1  ;;  %v463_v17 = vpop.f32.mrf.mxu2  ;;  %s702_s3 = smov [#allocation3]  }
  0xbe   :  { %550 = vperm.xlu1 %639, %v319_v33   ;;  %v472_v16 = vpop.f32.mrf.mxu3  ;;  %s596_s29 = sshll.u32 %s702_s3, 4  ;;  %s597_s29 = int_to_ptr.vmem [resolvable:$true] %s596_s29 }
  0xc2   :  { %v439_v48 = vpop.f32.mrf.mxu0 }
  0xc5   :  { %545 = vperm.xlu2 %640, %v309_v36  }
  0xc6   :  { %v475_v22 = vpop.f32.mrf.mxu3 }
  0xf7   :  { %v486_v45 = vpop.permute.xlu2 %485 }
  0xf8   :  { %v559_v46 = vmul.f32 %v486_v45, %v433_v41 }
  0xfa   :  { %575 = vst [vmem:[#allocation3 + $0x8] sm:$0xff] %v559_v46 }
  0xff   :  { %v496_v49 = vpop.permute.xlu2 %495 }
 0x100   :  { %v561_v50 = vmul.f32 %v496_v49, %v439_v48 }
 0x102   :  { %577 = vst [vmem:[#allocation3 + $0x18] sm:$0xff] %v561_v50 }
 0x107   :  { %v506_v40 = vpop.permute.xlu2 %505  ;;  %v481_v53 = vpop.permute.xlu1 %480 }
 0x108   :  { %v563_v54 = vmul.f32 %v506_v40, %v445_v47  ;;  %v558_v55 = vmul.f32 %v481_v53, %v430_v39  ;;  %v491_v56 = vpop.permute.xlu0 %490 }
 0x109   :  { %v560_v57 = vmul.f32 %v491_v56, %v436_v44 }
 0x10a   :  { %579 = vst [vmem:[#allocation3 + $0x28] sm:$0xff] %v563_v54 }
 0x10b   :  { %574 = vst [vmem:[#allocation3] sm:$0xff] %v558_v55 }
 0x10c   :  { %576 = vst [vmem:[#allocation3 + $0x10] sm:$0xff] %v560_v57 }
 0x10f   :  { %v516_v60 = vpop.permute.xlu2 %515  ;;  %v501_v61 = vpop.permute.xlu1 %500 }
 0x110   :  { %v565_v62 = vmul.f32 %v516_v60, %v451_v59  ;;  %v562_v63 = vmul.f32 %v501_v61, %v442_v43 }
 0x112   :  { %581 = vst [vmem:[#allocation3 + $0x38] sm:$0xff] %v565_v62 }
 0x113   :  { %578 = vst [vmem:[#allocation3 + $0x20] sm:$0xff] %v562_v63 }
 0x117   :  { %v531_v1 = vpop.permute.xlu2 %530  ;;  %v511_v2 = vpop.permute.xlu1 %510 }
 0x118   :  { %v568_v3 = vmul.f32 %v531_v1, %v460_v0  ;;  %v564_v4 = vmul.f32 %v511_v2, %v448_v52 }
 0x11a   :  { %584 = vst [vmem:[#allocation3 + $0x50] sm:$0xff] %v568_v3 }
 0x11b   :  { %580 = vst [vmem:[#allocation3 + $0x30] sm:$0xff] %v564_v4 }
 0x11f   :  { %v526_v6 = vpop.permute.xlu0 %525  ;;  %v546_v7 = vpop.permute.xlu2 %545 }
 0x120   :  { %v567_v9 = vmul.f32 %v526_v6, %v457_v58  ;;  %v571_v12 = vmul.f32 %v546_v7, %v469_v5  ;;  %v521_v13 = vpop.permute.xlu1 %520 }
 0x121   :  { %v566_v14 = vmul.f32 %v521_v13, %v454_v51 }
 0x122   :  { %583 = vst [vmem:[#allocation3 + $0x48] sm:$0xff] %v567_v9 }
 0x123   :  { %587 = vst [vmem:[#allocation3 + $0x68] sm:$0xff] %v571_v12 }
 0x124   :  { %582 = vst [vmem:[#allocation3 + $0x40] sm:$0xff] %v566_v14 }
 0x127   :  { %v541_v18 = vpop.permute.xlu0 %540 }
 0x128   :  { %v570_v19 = vmul.f32 %v541_v18, %v466_v42  ;;  %v536_v20 = vpop.permute.xlu1 %535 }
 0x129   :  { %v569_v21 = vmul.f32 %v536_v20, %v463_v17 }
 0x12a   :  { %586 = vst [vmem:[#allocation3 + $0x60] sm:$0xff] %v570_v19 }
 0x12b   :  { %585 = vst [vmem:[#allocation3 + $0x58] sm:$0xff] %v569_v21 }
 0x12f   :  { %v556_v11 = vpop.permute.xlu0 %555 }
 0x130   :  { %v573_v10 = vmul.f32 %v556_v11, %v475_v22  ;;  %v551_v15 = vpop.permute.xlu1 %550 }
 0x131   :  { %v572_v23 = vmul.f32 %v551_v15, %v472_v16 }
 0x132   :  { %589 = vst [vmem:[#allocation3 + $0x78] sm:$0xff] %v573_v10 }
 0x133   :  { %588 = vst [vmem:[#allocation3 + $0x70] sm:$0xff] %v572_v23 }
 0x134   :  { %604 = dma.vmem_to_hbm [thread:$0]  %s597_s29, 2048, %s599_s6, [#allocation4], %s703_s7, %s703_s7, %s704_s8  }
 0x135   :  { %698 = dma.done.wait [#allocation4], 2048  }
 0x136   :  { %699 = vsyncadd [#allocation4], 4294965248 }
 0x137   :  { %611 = vsyncpa [#allocation4], 1 }

</bundles_post_ra>
